<compile_context>
chip_gen: v7x
topology: tpu7x:2x2x1
jax: 0.10.0
libtpu: 0.0.40
codegen_flags: <defaults>
</compile_context>

<pallas_src>
import functools

import numpy as np
import jax
import jax.numpy as jnp
from jax.experimental import pallas as pl
from jax.experimental.pallas import tpu as pltpu

_F32_EPS = float(np.finfo(np.float32).eps)
_VMEM_LIMIT = 32 * 1024 * 1024


def _round_up(x, m):
    return (x + m - 1) // m * m


def _pick_mc_tile(num_class, hw):
    # ~4 MiB of f32 logits per pipeline buffer; also budget so that the
    # double-buffered pred+target blocks stay under ~12 MiB; clamp lanes to
    # [128, 65536]; never wider than one image's (128-rounded) pixel count.
    budget = (12 << 20) // (2 * 4 * (num_class + 1))
    tile = min((4 << 20) // (4 * num_class), budget)
    tile = max(128, min(tile, 1 << 16))
    tile = min(_round_up(tile, 128), _round_up(hw, 128))
    return tile


# --------------------------------------------------------------------------
# multi-class kernel: per-tile partial correct/valid counts (stateless)
# --------------------------------------------------------------------------
def _multi_class_kernel(pred_ref, tgt_ref, corr_ref, valid_ref, *,
                        num_class, hw, tile, topk, thresh, ignore_index):
    t = pl.program_id(1)

    logits = pred_ref[...].astype(jnp.float32)            # (C, tile)
    tgt = tgt_ref[...]                                    # (1, tile) int32

    # target-class logit via one-hot select; rank = #classes strictly larger.
    # (softmax is monotonic, so ranking logits == ranking softmax probs)
    cls = jax.lax.broadcasted_iota(jnp.int32, (num_class, tile), 0)
    one_hot = cls == tgt
    tgt_logit = jnp.sum(jnp.where(one_hot, logits, 0.0), axis=0, keepdims=True)
    rank = jnp.sum((logits > tgt_logit).astype(jnp.int32), axis=0,
                   keepdims=True)                         # (1, tile)

    # valid pixels: inside the (possibly ragged) image, not ignore_index.
    gidx = t * tile + jax.lax.broadcasted_iota(jnp.int32, (1, tile), 1)
    valid = gidx < hw
    if ignore_index is not None:
        valid = jnp.logical_and(valid, tgt != ignore_index)

    # only in-range labels can ever be "correct" (matches torch label.eq).
    hit = jnp.logical_and(valid,
                          jnp.logical_and(tgt >= 0, tgt < num_class))
    if thresh is not None:
        # softmax(tgt) > thresh  <=>  exp(tgt - max) > thresh * sum(exp(x-max))
        # (avoids the per-pixel divide)
        maxval = jnp.max(logits, axis=0, keepdims=True)
        sumexp = jnp.sum(jnp.exp(logits - maxval), axis=0, keepdims=True)
        hit = jnp.logical_and(
            hit, jnp.exp(tgt_logit - maxval) > jnp.float32(thresh) * sumexp)

    # per-tile partial counts (booleans -> f32 sums; garbage never leaks in).
    parts = [jnp.sum(jnp.logical_and(rank < k, hit).astype(jnp.float32),
                     axis=1, keepdims=True) for k in topk]     # each (1, 1)
    corr_ref[...] = jnp.concatenate(parts, axis=0)             # (num_k, 1)
    valid_ref[...] = jnp.sum(valid.astype(jnp.float32), axis=1, keepdims=True)


def accuracy_multi_class(pred, target, topk=(1,), thresh=None,
                         ignore_index=None):
    assert isinstance(topk, (int, tuple))
    if isinstance(topk, int):
        topk = (topk,)
        return_single = True
    else:
        return_single = False
    maxk = max(topk)

    if pred.shape[0] == 0:
        accu = [jnp.zeros((), jnp.float32) for _ in topk]
        return accu[0] if return_single else accu

    if target.ndim == pred.ndim:
        assert target.shape[1] == 1
        target = target[:, 0, ...]
    else:
        assert pred.ndim == target.ndim + 1
    assert pred.shape[0] == target.shape[0]
    N, C = pred.shape[0], pred.shape[1]
    assert maxk <= C, f"maxk {maxk} exceeds pred dimension {C}"

    HW = int(np.prod(pred.shape[2:])) if pred.ndim > 2 else 1
    # free, contiguous reshapes — no transpose, no pad copies in HBM.
    pred3 = pred.reshape(N, C, HW)
    tgt3 = target.reshape(N, 1, HW).astype(jnp.int32)

    tile = _pick_mc_tile(C, HW)
    n_tiles = int(pl.cdiv(HW, tile))
    num_k = len(topk)

    kernel = functools.partial(
        _multi_class_kernel, num_class=C, hw=HW, tile=tile,
        topk=tuple(topk), thresh=thresh, ignore_index=ignore_index)

    corr_parts, valid_parts = pl.pallas_call(
        kernel,
        out_shape=(jax.ShapeDtypeStruct((N * n_tiles, num_k, 1), jnp.float32),
                   jax.ShapeDtypeStruct((N * n_tiles, 1, 1), jnp.float32)),
        grid=(N, n_tiles),
        in_specs=[pl.BlockSpec((None, C, tile), lambda n, t: (n, 0, t)),
                  pl.BlockSpec((None, 1, tile), lambda n, t: (n, 0, t))],
        out_specs=(pl.BlockSpec((None, num_k, 1),
                                lambda n, t: (n * n_tiles + t, 0, 0)),
                   pl.BlockSpec((None, 1, 1),
                                lambda n, t: (n * n_tiles + t, 0, 0))),
        compiler_params=pltpu.CompilerParams(
            dimension_semantics=("parallel", "parallel"),
            vmem_limit_bytes=_VMEM_LIMIT),
    )(pred3, tgt3)

    eps = _F32_EPS
    corr = jnp.sum(corr_parts, axis=(0, 2))                 # (num_k,)
    if ignore_index is not None:
        total = jnp.sum(valid_parts)
    else:
        total = jnp.float32(N * HW)
    res = [((corr[j] + eps) * (100.0 / (total + eps))).reshape(1)
           for j in range(num_k)]
    return res[0] if return_single else res


# --------------------------------------------------------------------------
# single-class kernel: sigmoid + masked per-block sums of p*t, t, p
# --------------------------------------------------------------------------
_SC_BLOCK_ROWS = 4096      # 4096 x 128 f32 = 2 MiB per input block


def _single_class_kernel(pred_ref, tgt_ref, sums_ref, *,
                         total, block_rows, ignore_index):
    i = pl.program_id(0)

    x = pred_ref[...].astype(jnp.float32)          # (block_rows, 128)
    t = tgt_ref[...]                               # (block_rows, 128) f32
    p = jax.nn.sigmoid(x)

    ridx = i * block_rows + jax.lax.broadcasted_iota(jnp.int32, x.shape, 0)
    lidx = jax.lax.broadcasted_iota(jnp.int32, x.shape, 1)
    mask = (ridx * 128 + lidx) < total
    if ignore_index is not None:
        mask = jnp.logical_and(mask, t != ignore_index)
    # jnp.where (not multiply) so ragged-block garbage / NaN cannot leak in.
    p = jnp.where(mask, p, 0.0)
    t = jnp.where(mask, t, 0.0)

    sums_ref[...] = jnp.concatenate(
        [jnp.sum(p * t, keepdims=True),
         jnp.sum(t, keepdims=True),
         jnp.sum(p, keepdims=True)], axis=0)       # (3, 1)


def accuracy_single_class(pred, target, ignore_index=None):
    if pred.shape[0] == 0:
        return jnp.zeros((), jnp.float32)

    if target.shape == pred.shape:
        assert target.shape[1] == 1 and pred.shape[1] == 1
        target = target[:, 0, ...]
        pred = pred[:, 0, ...]
    else:
        assert pred.ndim == target.ndim + 1
        assert pred.shape[1] == 1
        pred = pred[:, 0, ...]
    assert pred.shape[0] == target.shape[0]

    P = int(np.prod(pred.shape))
    pf = pred.reshape(-1)
    tf = target.reshape(-1).astype(jnp.float32)

    rows = int(pl.cdiv(P, 128))
    pad = rows * 128 - P
    if pad:  # only when the element count is not 128-divisible (rare)
        pf = jnp.pad(pf, (0, pad))
        tf = jnp.pad(tf, (0, pad))
    pf = pf.reshape(rows, 128)
    tf = tf.reshape(rows, 128)

    block_rows = min(_SC_BLOCK_ROWS, rows)
    grid = int(pl.cdiv(rows, block_rows))

    kernel = functools.partial(_single_class_kernel, total=P,
                               block_rows=block_rows,
                               ignore_index=ignore_index)

    # TODO(synk): torch sums tpfp1/tpfp2 in float64; JAX x64 is off here, so
    # the reductions use float32 accumulation instead.
    sums = pl.pallas_call(
        kernel,
        out_shape=jax.ShapeDtypeStruct((grid, 3, 1), jnp.float32),
        grid=(grid,),
        in_specs=[pl.BlockSpec((block_rows, 128), lambda i: (i, 0)),
                  pl.BlockSpec((block_rows, 128), lambda i: (i, 0))],
        out_specs=pl.BlockSpec((None, 3, 1), lambda i: (i, 0, 0)),
        compiler_params=pltpu.CompilerParams(
            dimension_semantics=("parallel",),
            vmem_limit_bytes=_VMEM_LIMIT),
    )(pf, tf)

    tp = jnp.sum(sums[:, 0, 0])
    st = jnp.sum(sums[:, 1, 0])
    sp = jnp.sum(sums[:, 2, 0])
    return (tp * 2 / (st + sp)).astype(jnp.float32) * 100.0


class Accuracy:
    """Accuracy calculation module (JAX / Pallas-TPU port)."""

    def __init__(self, topk=(1,), thresh=None, ignore_index=None):
        self.topk = topk
        self.thresh = thresh
        self.ignore_index = ignore_index

    def __call__(self, pred, target):
        if pred.shape[1] > 1:
            return accuracy_multi_class(pred, target, self.topk, self.thresh,
                                        self.ignore_index)
        else:
            return accuracy_single_class(pred, target, self.ignore_index)


if __name__ == "__main__":
    key = jax.random.PRNGKey(0)
    k1, k2, k3, k4 = jax.random.split(key, 4)
    eps = _F32_EPS

    # ---- multi-class path: pred (N, C, H, W), target (N, H, W) ----
    pred = jax.random.normal(k1, (2, 4, 16, 16), jnp.float32)
    target = jax.random.randint(k2, (2, 16, 16), 0, 4, jnp.int32)

    # top-1, no ignore / thresh
    res = Accuracy(topk=(1,))(pred, target)
    res = [jax.block_until_ready(r) for r in res]
    lab1 = jnp.argmax(pred, axis=1)
    ref1 = (jnp.sum((lab1 == target).astype(jnp.float32)) + eps) * (
        100.0 / (target.size + eps))
    assert abs(float(res[0][0]) - float(ref1)) < 1e-3, (res, ref1)

    # top-(1,2) with ignore_index
    res12 = Accuracy(topk=(1, 2), ignore_index=3)(pred, target)
    res12 = [jax.block_until_ready(r) for r in res12]
    vm = target != 3
    top2 = jnp.argsort(-pred, axis=1)[:, :2]
    c1 = (lab1 == target) & vm
    c2 = jnp.any(top2 == target[:, None], axis=1) & vm
    tot = jnp.sum(vm).astype(jnp.float32)
    ref_1 = (jnp.sum(c1.astype(jnp.float32)) + eps) * (100.0 / (tot + eps))
    ref_2 = (jnp.sum(c2.astype(jnp.float32)) + eps) * (100.0 / (tot + eps))
    assert abs(float(res12[0][0]) - float(ref_1)) < 1e-3, (res12, ref_1)
    assert abs(float(res12[1][0]) - float(ref_2)) < 1e-3, (res12, ref_2)

    # top-1 with softmax threshold
    resth = Accuracy(topk=1, thresh=0.3)(pred, target)
    resth = jax.block_until_ready(resth)
    prob = jax.nn.softmax(pred, axis=1)
    pmax = jnp.max(prob, axis=1)
    cth = (lab1 == target) & (pmax > 0.3)
    refth = (jnp.sum(cth.astype(jnp.float32)) + eps) * (
        100.0 / (target.size + eps))
    assert abs(float(resth[0]) - float(refth)) < 1e-3, (resth, refth)

    # ---- single-class path: pred (N, 1, H, W), target (N, H, W) ----
    pred_s = jax.random.normal(k3, (2, 1, 16, 16), jnp.float32)
    target_s = jax.random.randint(k4, (2, 16, 16), 0, 2, jnp.int32).astype(
        jnp.float32)

    acc_s = Accuracy()(pred_s, target_s)
    acc_s = jax.block_until_ready(acc_s)
    p_ref = jax.nn.sigmoid(pred_s[:, 0])
    ref_s = (jnp.sum(p_ref * target_s) * 2 /
             (jnp.sum(target_s) + jnp.sum(p_ref))) * 100.0
    assert abs(float(acc_s) - float(ref_s)) < 1e-2, (acc_s, ref_s)

    print("KERNEL_OK")
</pallas_src>

<mosaic_0001>
module attributes {stable_mosaic.version = 11 : i64} {
  func.func @_multi_class_kernel(%arg0: i32, %arg1: i32, %arg2: memref<1x4x256xf32, #tpu.memory_space<vmem>>, %arg3: memref<1x1x256xi32, #tpu.memory_space<vmem>>, %arg4: memref<1x1x1xf32, #tpu.memory_space<vmem>>, %arg5: memref<1x1x1xf32, #tpu.memory_space<vmem>>) attributes {dimension_semantics = [#tpu.dimension_semantics<parallel>, #tpu.dimension_semantics<parallel>], iteration_bounds = array<i64: 2, 1>, scalar_prefetch = 0 : i64, scratch_operands = 0 : i64, tpu.core_type = #tpu.core_type<tc>, window_params = [{transform_indices = @transform_0, window_bounds = array<i64: 1, 4, 256>}, {transform_indices = @transform_1, window_bounds = array<i64: 1, 1, 256>}, {transform_indices = @transform_2, window_bounds = array<i64: 1, 1, 1>}, {transform_indices = @transform_3, window_bounds = array<i64: 1, 1, 1>}]} {
    %c0 = arith.constant 0 : index
    %c0_0 = arith.constant 0 : index
    %c0_1 = arith.constant 0 : index
    %0 = vector.load %arg2[%c0, %c0_0, %c0_1] : memref<1x4x256xf32, #tpu.memory_space<vmem>>, vector<1x4x256xf32>
    %1 = vector.shape_cast %0 : vector<1x4x256xf32> to vector<4x256xf32>
    %c0_2 = arith.constant 0 : index
    %c0_3 = arith.constant 0 : index
    %c0_4 = arith.constant 0 : index
    %2 = vector.load %arg3[%c0_2, %c0_3, %c0_4] : memref<1x1x256xi32, #tpu.memory_space<vmem>>, vector<1x1x256xi32>
    %3 = vector.shape_cast %2 : vector<1x1x256xi32> to vector<1x256xi32>
    %4 = tpu.iota {dimensions = array<i32: 0>} : vector<4x256xi32>
    %5 = vector.broadcast %3 : vector<1x256xi32> to vector<4x256xi32>
    %6 = arith.cmpi eq, %4, %5 : vector<4x256xi32>
    %cst = arith.constant 0.000000e+00 : f32
    %7 = vector.broadcast %cst : f32 to vector<4x256xf32>
    %8 = arith.select %6, %1, %7 : vector<4x256xi1>, vector<4x256xf32>
    %cst_5 = arith.constant dense<0.000000e+00> : vector<256xf32>
    %9 = vector.multi_reduction <add>, %8, %cst_5 [0] : vector<4x256xf32> to vector<256xf32>
    %10 = vector.shape_cast %9 : vector<256xf32> to vector<1x256xf32>
    %11 = vector.broadcast %10 : vector<1x256xf32> to vector<4x256xf32>
    %12 = arith.cmpf ogt, %1, %11 : vector<4x256xf32>
    %13 = arith.extui %12 : vector<4x256xi1> to vector<4x256xi32>
    %cst_6 = arith.constant dense<0> : vector<256xi32>
    %14 = vector.multi_reduction <add>, %13, %cst_6 [0] : vector<4x256xi32> to vector<256xi32>
    %15 = vector.shape_cast %14 : vector<256xi32> to vector<1x256xi32>
    %c256_i32 = arith.constant 256 : i32
    %16 = arith.muli %arg1, %c256_i32 : i32
    %17 = tpu.iota {dimensions = array<i32: 1>} : vector<1x256xi32>
    %18 = vector.broadcast %16 : i32 to vector<1x256xi32>
    %19 = arith.addi %18, %17 : vector<1x256xi32>
    %c256_i32_7 = arith.constant 256 : i32
    %20 = vector.broadcast %c256_i32_7 : i32 to vector<1x256xi32>
    %21 = arith.cmpi slt, %19, %20 : vector<1x256xi32>
    %c0_i32 = arith.constant 0 : i32
    %22 = vector.broadcast %c0_i32 : i32 to vector<1x256xi32>
    %23 = arith.cmpi sge, %3, %22 : vector<1x256xi32>
    %c4_i32 = arith.constant 4 : i32
    %24 = vector.broadcast %c4_i32 : i32 to vector<1x256xi32>
    %25 = arith.cmpi slt, %3, %24 : vector<1x256xi32>
    %26 = arith.andi %23, %25 : vector<1x256xi1>
    %27 = arith.andi %21, %26 : vector<1x256xi1>
    %c1_i32 = arith.constant 1 : i32
    %28 = vector.broadcast %c1_i32 : i32 to vector<1x256xi32>
    %29 = arith.cmpi slt, %15, %28 : vector<1x256xi32>
    %30 = arith.andi %29, %27 : vector<1x256xi1>
    %31 = arith.extui %30 : vector<1x256xi1> to vector<1x256xi32>
    %32 = arith.sitofp %31 : vector<1x256xi32> to vector<1x256xf32>
    %cst_8 = arith.constant dense<0.000000e+00> : vector<1xf32>
    %33 = vector.multi_reduction <add>, %32, %cst_8 [1] : vector<1x256xf32> to vector<1xf32>
    %34 = vector.shape_cast %33 : vector<1xf32> to vector<1x1xf32>
    %c0_9 = arith.constant 0 : index
    %c0_10 = arith.constant 0 : index
    %c0_11 = arith.constant 0 : index
    %35 = vector.load %arg4[%c0_9, %c0_10, %c0_11] : memref<1x1x1xf32, #tpu.memory_space<vmem>>, vector<1x1x1xf32>
    %36 = vector.shape_cast %35 : vector<1x1x1xf32> to vector<1x1xf32>
    %37 = vector.shape_cast %34 : vector<1x1xf32> to vector<1x1x1xf32>
    tpu.vector_store %arg4[%c0_9, %c0_10, %c0_11], %37 {strides = array<i32>} : memref<1x1x1xf32, #tpu.memory_space<vmem>>, vector<1x1x1xf32>,
    %38 = arith.extui %21 : vector<1x256xi1> to vector<1x256xi32>
    %39 = arith.sitofp %38 : vector<1x256xi32> to vector<1x256xf32>
    %cst_12 = arith.constant dense<0.000000e+00> : vector<1xf32>
    %40 = vector.multi_reduction <add>, %39, %cst_12 [1] : vector<1x256xf32> to vector<1xf32>
    %41 = vector.shape_cast %40 : vector<1xf32> to vector<1x1xf32>
    %c0_13 = arith.constant 0 : index
    %c0_14 = arith.constant 0 : index
    %c0_15 = arith.constant 0 : index
    %42 = vector.load %arg5[%c0_13, %c0_14, %c0_15] : memref<1x1x1xf32, #tpu.memory_space<vmem>>, vector<1x1x1xf32>
    %43 = vector.shape_cast %42 : vector<1x1x1xf32> to vector<1x1xf32>
    %44 = vector.shape_cast %41 : vector<1x1xf32> to vector<1x1x1xf32>
    tpu.vector_store %arg5[%c0_13, %c0_14, %c0_15], %44 {strides = array<i32>} : memref<1x1x1xf32, #tpu.memory_space<vmem>>, vector<1x1x1xf32>,
    return
  }
  func.func @transform_0(%arg0: i32, %arg1: i32) -> (i32, i32, i32) {
    %c0_i32 = arith.constant 0 : i32
    %c0_i32_0 = arith.constant 0 : i32
    return %arg0, %c0_i32, %arg1 : i32, i32, i32
  }
  func.func @transform_1(%arg0: i32, %arg1: i32) -> (i32, i32, i32) {
    %c0_i32 = arith.constant 0 : i32
    %c0_i32_0 = arith.constant 0 : i32
    return %arg0, %c0_i32, %arg1 : i32, i32, i32
  }
  func.func @transform_2(%arg0: i32, %arg1: i32) -> (i32, i32, i32) {
    %c1_i32 = arith.constant 1 : i32
    %0 = arith.muli %arg0, %c1_i32 : i32
    %1 = arith.addi %0, %arg1 : i32
    %c0_i32 = arith.constant 0 : i32
    %c0_i32_0 = arith.constant 0 : i32
    %c0_i32_1 = arith.constant 0 : i32
    return %1, %c0_i32, %c0_i32_0 : i32, i32, i32
  }
  func.func @transform_3(%arg0: i32, %arg1: i32) -> (i32, i32, i32) {
    %c1_i32 = arith.constant 1 : i32
    %0 = arith.muli %arg0, %c1_i32 : i32
    %1 = arith.addi %0, %arg1 : i32
    %c0_i32 = arith.constant 0 : i32
    %c0_i32_0 = arith.constant 0 : i32
    %c0_i32_1 = arith.constant 0 : i32
    return %1, %c0_i32, %c0_i32_0 : i32, i32, i32
  }
}

</mosaic_0001>

<bundles_post_ra>
// kernel: tpu_custom_call.1
= control target key start
LH: loop header
LB: loop body
LE: loop exit
PB: predicated region body
PF: predicated region fallthrough
CT: control target
= control target key end

     0   :  { %9 = vsyncpa [#allocation3], 0  ;;  %s892_s0 = inlined_call_operand.hbm [shape: f32[2,4,256], index: 0, kind: input, shape index: {}]   ;;  %s893_s1 = inlined_call_operand.hbm [shape: s32[2,1,256], index: 1, kind: input, shape index: {}]   ;;  %s894_s2 = inlined_call_operand.vmem [shape: f32[2,1,1], index: 2, kind: output, shape index: {0}]   ;;  %s895_s3 = inlined_call_operand.vmem [shape: f32[2,1,1], index: 3, kind: output, shape index: {1}]  }
   0x1   :  { %11 = vsyncpa [#allocation3 + $0x1], 0 }
   0x2   :  { %12 = vsyncpa [#allocation5], 0 }
   0x3   :  { %14 = vsyncpa [#allocation5 + $0x1], 0  ;;  %s719_s12 = smov 0   ;;  %s721_s13 = smov 0  }
   0x4   :  { %s723_s14 = smov 0   ;;  %s725_s15 = smov 0  }
   0x5   :  { %s727_s16 = smov 0   ;;  %s729_s17 = smov 0  }
   0x6 LB: > { %s495_s18 = sadd.s32 4294967295, %s692_s17   ;;  %s32_s19 = sadd.s32 1, %s688_s16  ;;  %s692_s17 = sphi %s729_s17, %s20_s17   ;;  %s688_s16 = sphi %s727_s16, %s909_s16   ;;  %s684_s15 = sphi %s725_s15, %s908_s15   ;;  %s680_s14 = sphi %s723_s14, %s907_s14   ;;  %s676_s13 = sphi %s721_s13, %s906_s13   ;;  %s672_s12 = sphi %s719_s12, %s905_s12  }
   0x7   : > { %p34_p0 = scmp.ge.s32.totalorder %s32_s19, 2  ;;  %s41_s20 = sadd.s32 1, %s680_s14 }
   0x8   : > { %p48_p1 = scmp.ne.s32.totalorder %s680_s14, %s676_s13  ;;  %p49_p2 = scmp.eq.s32.totalorder %s692_s17, 0 }
   0x9   : > { %s911_s19 = smov (%p34_p0, %s32_s19), 0  ;;  %p54_p4 = scmp.ne.s32.totalorder %s676_s13, %s672_s12 }
   0xa   : > { %p755_p3 = por %p49_p2, %p48_p1  ;;  %s36_s22 = ssub.s32 %s688_s16, %s911_s19 }
   0xb   : > { %p55_p5 = scmp.eq.s32.totalorder %s495_s18, 0  ;;  %p39_p6 = scmp.eq.s32.totalorder %s36_s22, 0 }
   0xc   : > { %p525_p8 = scmp.lt.s32.totalorder %s692_s17, 2  ;;  %s771_s25 = sand.u32 1, %s680_s14  }
   0xd   : > { %p762_p7 = por %p55_p5, %p54_p4  ;;  %s512_s26 = sshll.u32 %s688_s16, 7 }
   0xe   : > { %s768_s24 = scalar_select %p39_p6, %s680_s14, %s41_s20  }
   0xf   : > { %s898_s23 = scalar_select %p762_p7, 1, 0 }
  0x10   : > { %s499_s27 = sshll.u32 %s771_s25, 3  ;;  %s778_s30 = scalar_lea.hbm %s892_s0, %s512_s26 }
  0x11   : > { %s166_s4 = scalar_lea.vmem [#allocation2], %s499_s27  ;;  %p782_p9 = pnand %p525_p8, %p755_p3 }
  0x12   : > { %s176_s5 = sshll.u32 %s166_s4, 4  ;;  %s163_s7 = scalar_lea.sflag [#allocation3], %s771_s25  ;;  %s786_s5 = int_to_ptr.vmem [resolvable:$true] %s176_s5 }
  0x13   : > { %s578_s8 = scalar_lea.hbm %s778_s30, 128  ;;  %p580_p13 = pneg %p782_p9 }
  0x14   : > { %p579_p12 = scmp.ne.s32.totalorder %s778_s30, %s578_s8  ;;  %s583_s11 = scalar_lea.hbm %s892_s0, 256 }
  0x15   : > { %p584_p2 = scmp.lt.u32.totalorder %s778_s30, %s892_s0  ;;  %p585_p3 = scmp.lt.u32.totalorder %s583_s11, %s578_s8 }
  0x16   : > { %p581_p0 = pnand %p580_p13, %p579_p12  ;;  %p587_p5 = scmp.lt.u32.totalorder %s578_s8, %s778_s30 }
  0x17   : > { %p586_p4 = por %p585_p3, %p584_p2 }
  0x18   : > { %p582_p1 = pneg %p581_p0 }
  0x19   : > { %p588_p6 = por %p587_p5, %p586_p4 }
  0x1b   : > { %p589_p8 = pnand %p588_p6, %p582_p1 }
  0x1d   : > { %592 = shalt.err (!%p589_p8)
}
  0x1e   : > { %s593_s20 = scalar_lea.vmem %s786_s5, 128  ;;  %s694_s21 = smov [#allocation2]  }
  0x1f   : > { %p594_p12 = scmp.ne.s32.totalorder %s786_s5, %s593_s20  ;;  %s598_s22 = sshll.u32 %s694_s21, 4  ;;  %s599_s22 = int_to_ptr.vmem [resolvable:$false] %s598_s22 }
  0x20   : > { %s600_s26 = scalar_lea.vmem %s599_s22, 256  ;;  %p601_p11 = scmp.lt.s32.totalorder %s786_s5, %s599_s22 }
  0x21   : > { %p596_p0 = pnand %p594_p12, %p580_p13  ;;  %p602_p2 = scmp.lt.s32.totalorder %s600_s26, %s593_s20 }
  0x23   : > { %p597_p10 = pneg %p596_p0  ;;  %p603_p3 = por %p602_p2, %p601_p11 }
  0x25   : > { %p604_p4 = pnand %p603_p3, %p597_p10 }
  0x27   : > { %607 = shalt.err (!%p604_p4)
}
  0x28   : > { %521 = dma.hbm_to_vmem [thread:$0]  (!%p782_p9), %s778_s30, 128, %s786_s5, %s163_s7  }
  0x29   : > { %p900_p1 = scmp.lt.s32.totalorder %s692_s17, 3  ;;  %p901_p5 = scmp.ge.s32.totalorder %s692_s17, 1 }
  0x2a   : > { %s502_s28 = sshll.u32 %s771_s25, 1  ;;  %s513_s29 = sshll.u32 %s688_s16, 5 }
  0x2b   : > { %p820_p6 = pnand %p901_p5, %p900_p1  ;;  %s829_s9 = scalar_lea.hbm %s893_s1, %s513_s29 }
  0x2c   : > { %s187_s10 = scalar_lea.vmem [#allocation4], %s502_s28  ;;  %s184_s30 = scalar_lea.sflag [#allocation5], %s771_s25 }
  0x2d   : > { %s902_s27 = scalar_select %p820_p6, 1, 0 }
  0x2e   : > { %s197_s11 = sshll.u32 %s187_s10, 4  ;;  %s608_s5 = scalar_lea.hbm %s829_s9, 32  ;;  %s198_s11 = int_to_ptr.vmem [resolvable:$true] %s197_s11 }
  0x2f   : > { %p609_p10 = scmp.ne.s32.totalorder %s829_s9, %s608_s5  ;;  %s613_s18 = scalar_lea.hbm %s893_s1, 64 }
  0x30   : > { %p614_p12 = scmp.lt.u32.totalorder %s829_s9, %s893_s1  ;;  %p615_p0 = scmp.lt.u32.totalorder %s613_s18, %s608_s5 }
  0x31   : > { %p611_p11 = pnand %p609_p10, %p580_p13  ;;  %p617_p3 = scmp.lt.u32.totalorder %s608_s5, %s829_s9 }
  0x32   : > { %p616_p2 = por %p615_p0, %p614_p12 }
  0x33   : > { %p612_p8 = pneg %p611_p11 }
  0x34   : > { %p618_p4 = por %p617_p3, %p616_p2 }
  0x36   : > { %p619_p1 = pnand %p618_p4, %p612_p8 }
  0x38   : > { %622 = shalt.err (!%p619_p1)
}
  0x39   : > { %s623_s25 = scalar_lea.vmem %s198_s11, 32  ;;  %s695_s22 = smov [#allocation4]  }
  0x3a   : > { %p624_p5 = scmp.ne.s32.totalorder %s198_s11, %s623_s25  ;;  %s628_s26 = sshll.u32 %s695_s22, 4  ;;  %s629_s26 = int_to_ptr.vmem [resolvable:$false] %s628_s26 }
  0x3b   : > { %s630_s28 = scalar_lea.vmem %s629_s26, 64  ;;  %p631_p7 = scmp.lt.s32.totalorder %s198_s11, %s629_s26 }
  0x3c   : > { %p626_p10 = pnand %p624_p5, %p580_p13  ;;  %p632_p6 = scmp.lt.s32.totalorder %s630_s28, %s623_s25 }
  0x3e   : > { %p627_p11 = pneg %p626_p10  ;;  %p633_p0 = por %p632_p6, %p631_p7 }
  0x40   : > { %p634_p12 = pnand %p633_p0, %p627_p11 }
  0x42   : > { %637 = shalt.err (!%p634_p12)
}
  0x43   : > { %524 = dma.hbm_to_vmem [thread:$0]  (!%p782_p9), %s829_s9, 32, %s198_s11, %s184_s30  }
  0x44   : > { %p903_p8 = scmp.ne.s32.totalorder %s902_s27, 0 }
  0x45   : > { %s208_s29 = sand.u32 (!%p903_p8), 1, %s676_s13   ;;  %p904_p13 = scmp.ne.s32.totalorder (!%p903_p8), %s898_s23, 0 }
  0x46   : > { %206 = sbr.rel (%p903_p8) target bundleno = 276 (0x114), region = 28  ;;  %s506_s4 = sshll.u32 (!%p903_p8), %s208_s29, 3 }
  0x47   : > { %s209_s8 = scalar_lea.sflag (!%p903_p8), [#allocation3], %s208_s29  ;;  %s212_s10 = scalar_lea.vmem (!%p903_p8), [#allocation2], %s506_s4 }
  0x4d   : > { %663 = dma.done.wait (%p904_p13), %s209_s8, 128  }
  0x4e   : > { %665 = vsyncadd (%p904_p13), %s209_s8, 4294967168  ;;  %s507_s5 = sshll.u32 %s208_s29, 1  ;;  %s218_s7 = scalar_lea.sflag [#allocation5], %s208_s29 }
  0x4f   : > { %s221_s6 = scalar_lea.vmem [#allocation4], %s507_s5 }
  0x50   : > { %667 = dma.done.wait (%p904_p13), %s218_s7, 32  }
  0x51   : > { %669 = vsyncadd (%p904_p13), %s218_s7, 4294967264  ;;  %v266_v0 = vlaneseq  ;;  %v264_v4 = vld [vmem:[%s212_s10] sm:$0xff]  ;;  %v265_v5 = vld [vmem:[%s221_s6] sm:$0x3]  ;;  %vm283_vm0 = vcmask 1043456   ;;  %v696_v26 = vmov 0  }
  0x52   : > { %v279_v8 = vcombine.high %v264_v4, %v264_v4  ;;  %vm328_vm4 = vcmp.ge.s32.totalorder %v265_v5, 0  ;;  %vm329_vm5 = vcmp.lt.s32.totalorder %v265_v5, 4  ;;  %vm352_vm10 = vcmask 1040384   ;;  %p255_p7 = scmp.lt.s32.totalorder %s684_s15, 1 }
  0x53   : > { %v267_v1 = vshrl.u32 %v266_v0, 7  ;;  %vm330_vm6 = vmand %vm328_vm4, %vm329_vm5  ;;  %v697_v46 = vmov 0.0   ;;  %v698_v52 = vmov 2.0   ;;  %vm358_vm14 = vcmask 0  }
  0x54   : > { %v331_v34 = vsel %vm330_vm6, 1, %v696_v26  ;;  %s913_s15 = smov (!%p255_p7, %s684_s15), 1 }
  0x55   : > { %v270_v2 = vsub.s32 0, %v267_v1  ;;  %v274_v3 = vsub.s32 1, %v267_v1  ;;  %s257_s9 = scalar_lea.vmem %s894_s2, %s913_s15  ;;  %s262_s12 = scalar_lea.vmem %s895_s3, %s913_s15 }
  0x57   : > { %v271_v6 = vrot.slane %v265_v5, %v270_v2  ;;  %v275_v7 = vrot.slane %v265_v5, %v274_v3  ;;  %v335_v39 = vrot.slane %v331_v34, %v270_v2  ;;  %v339_v42 = vrot.slane %v331_v34, %v274_v3 }
  0x59   : > { %vm276_vm1 = vcmp.eq.s32.totalorder %v267_v1, %v271_v6  ;;  %vm277_vm2 = vcmp.eq.s32.totalorder %v267_v1, %v275_v7  ;;  %vm340_vm7 = vcmp.ne.s32.totalorder %v335_v39, 0  ;;  %vm341_vm8 = vcmp.ne.s32.totalorder %v339_v42, 0 }
  0x5a   : > { %v281_v9 = vsel %vm276_vm1, %v264_v4, 0.0  ;;  %v282_v10 = vsel %vm277_vm2, %v279_v8, 0.0 }
  0x5b   : > { %v284_v11 = vsel %vm283_vm0, %v281_v9, 0.0  ;;  %v291_v12 = vsel %vm283_vm0, %v282_v10, 0.0 }
  0x5c   : > { %v285_v13 = vrot.slane %v284_v11, 4  ;;  %v292_v14 = vrot.slane %v291_v12, 4 }
  0x5e   : > { %v286_v15 = vadd.f32 %v285_v13, %v284_v11  ;;  %v293_v16 = vadd.f32 %v292_v14, %v291_v12 }
  0x60   : > { %v287_v17 = vrot.slane %v286_v15, 2  ;;  %v294_v18 = vrot.slane %v293_v16, 2 }
  0x62   : > { %v288_v19 = vadd.f32 %v287_v17, %v286_v15  ;;  %v295_v20 = vadd.f32 %v294_v18, %v293_v16 }
  0x64   : > { %v289_v21 = vrot.slane %v288_v19, 1  ;;  %v296_v22 = vrot.slane %v295_v20, 1 }
  0x66   : > { %v290_v23 = vadd.f32 %v289_v21, %v288_v19  ;;  %v297_v24 = vadd.f32 %v296_v22, %v295_v20 }
  0x68   : > { %v300_v25 = vcombine.low %v290_v23, %v297_v24 }
  0x6a   : > { %vm302_vm3 = vcmp.gt.f32.partialorder %v264_v4, %v300_v25 }
  0x6b   : > { %v303_v27 = vsel %vm302_vm3, 1, %v696_v26 }
  0x6c   : > { %v304_v28 = vcombine.high %v303_v27, %v303_v27  ;;  %v305_v29 = vsel %vm283_vm0, %v303_v27, 0 }
  0x6d   : > { %v306_v30 = vrot.slane %v305_v29, 4 }
  0x6e   : > { %v312_v31 = vsel %vm283_vm0, %v304_v28, 0 }
  0x6f   : > { %v307_v32 = vadd.s32 %v306_v30, %v305_v29  ;;  %v313_v33 = vrot.slane %v312_v31, 4 }
  0x71   : > { %v308_v35 = vrot.slane %v307_v32, 2  ;;  %v314_v36 = vadd.s32 %v313_v33, %v312_v31 }
  0x73   : > { %v309_v37 = vadd.s32 %v308_v35, %v307_v32  ;;  %v315_v38 = vrot.slane %v314_v36, 2 }
  0x75   : > { %v310_v40 = vrot.slane %v309_v37, 1  ;;  %v316_v41 = vadd.s32 %v315_v38, %v314_v36 }
  0x77   : > { %v311_v43 = vadd.s32 %v310_v40, %v309_v37  ;;  %v317_v44 = vrot.slane %v316_v41, 1 }
  0x79   : > { %v318_v45 = vadd.s32 %v317_v44, %v316_v41  ;;  %vm344_vm9 = vcmp.lt.s32.totalorder %v311_v43, 1 }
  0x7a   : > { %vm346_vm11 = vmand %vm344_vm9, %vm340_vm7 }
  0x7b   : > { %vm345_vm12 = vcmp.lt.s32.totalorder %v318_v45, 1  ;;  %v508_v47 = vsel %vm346_vm11, 1.0, %v697_v46 }
  0x7c   : > { %vm347_vm13 = vmand %vm345_vm12, %vm341_vm8  ;;  %v353_v48 = vsel %vm352_vm10, %v508_v47, 0.0 }
  0x7d   : > { %v509_v49 = vsel %vm347_vm13, 1.0, %v697_v46 }
  0x7e   : > { %v354_v50 = vsel %vm352_vm10, %v509_v49, 0.0 }
  0x7f   : > { %v355_v51 = vadd.f32 %v354_v50, %v353_v48 }
  0x81   : > { %356 = vadd.xlane.f32.xlu0 %v355_v51 }
  0x85   : > { %365 = vadd.xlane.f32.xlu0 %v698_v52 }
 0x10e   : > { %v357_v53 = vpop.xlane.xlu0 %356 }
 0x10f   : > { %359 = vst.msk [vmem:[%s257_s9] sm:$0x1] %vm358_vm14, %v357_v53 }
 0x112   : > { %v366_v54 = vpop.xlane.xlu0 %365 }
 0x113   : > { %367 = vst.msk [vmem:[%s262_s12] sm:$0x1] %vm358_vm14, %v366_v54 }
 0x114 PF: > { %s20_s17 = sadd.s32 1, %s692_s17   ;;  %s905_s12 = smov %s676_s13 }
 0x115   : > { %p17_p9 = scmp.ge.s32.totalorder %s20_s17, 4   ;;  %s906_s13 = smov %s680_s14 }
 0x116   : > { %s907_s14 = smov %s768_s24  ;;  %s908_s15 = smov %s688_s16 }
 0x117   : > { %s909_s16 = smov %s911_s19  ;;  %19 = sbr.rel (!%p17_p9) target bundleno = 6 (0x6), region = 93 }
 0x11e   :  { %403 = vsyncpa [#allocation3], 1 }
 0x11f   :  { %405 = vsyncpa [#allocation3 + $0x1], 1 }
 0x120   :  { %406 = vsyncpa [#allocation5], 1 }
 0x121   :  { %408 = vsyncpa [#allocation5 + $0x1], 1 }

</bundles_post_ra>
